<compile_context>
chip_gen: v7x
topology: tpu7x:2x2x1
jax: 0.10.0
libtpu: 0.0.40
codegen_flags: <defaults>
</compile_context>

<pallas_src>
import functools

import jax
import jax.numpy as jnp
from jax.experimental import pallas as pl
from jax.experimental.pallas import tpu as pltpu


def _local_op_kernel(x_ref, w1_ref, w2_ref, shift_ref, o_ref, *,
                     groups, s, compute_dtype):
    # x_ref: (G*s, d) — G point-groups stacked along rows, channels-last.
    x = x_ref[...]
    # conv1 (1x1) with BN1 scale pre-folded into the weights, + shift + ReLU.
    h1 = jnp.dot(x, w1_ref[...], preferred_element_type=jnp.float32)     # (G*s, Cp) f32
    h1 = jnp.maximum(h1 + shift_ref[0:1, :], 0.0)
    # conv2 (1x1) with BN2 scale pre-folded, + shift + ReLU.
    h2 = jnp.dot(h1.astype(compute_dtype), w2_ref[...],
                 preferred_element_type=jnp.float32)                     # (G*s, Cp) f32
    h2 = jnp.maximum(h2 + shift_ref[1:2, :], 0.0)
    # adaptive_max_pool1d(., 1): max over the s points of each group.
    Cp = h2.shape[-1]
    o_ref[...] = jnp.max(h2.reshape(groups, s, Cp), axis=1)              # (G, Cp)


def _chip_defaults():
    """(target MXU rows per step, minimum grid steps) per TPU generation."""
    try:
        kind = jax.devices()[0].device_kind.lower()
    except Exception:
        kind = ""
    if "v7" in kind:
        return 256, 4            # 256-wide MXU, 2 TensorCores -> >=2 steps/core
    if "v6" in kind or "trillium" in kind:
        return 256, 2            # 256-wide MXU, 1 TensorCore
    return 128, 2                # v5e/v5p/v4/...: 128-wide MXU, 1 TensorCore


def _choose_group_tile(B, s, target_rows, min_steps):
    """Groups per grid step: multiple of 8 (sublane-dense (G, Cp) output blocks),
    G*s near the per-chip MXU row target, and >= min_steps grid steps."""
    g = max(1, target_rows // max(s, 1))
    g = max(8, (g // 8) * 8)                      # sublane-dense output blocks
    g = min(g, max(8, ((B + 7) // 8) * 8))        # don't over-pad a tiny B
    while g > 8 and pl.cdiv(B, g) < min_steps:    # keep the pipeline fed
        g -= 8
    return g


def local_op_forward(x, w1, w2, bn1, bn2, eps=1e-5,
                     compute_dtype=jnp.float32, target_rows=None):
    """x: (b, n, s, d). w1: (C, d), w2: (C, C) (Conv1d weights, k=1 squeezed).
    bn1/bn2: dicts with gamma, beta, mean, var of shape (C,).
    compute_dtype: jnp.float32 (exact) or jnp.bfloat16 (production)."""
    b, n, s, d = x.shape
    C = w1.shape[0]
    B = b * n

    tgt, min_steps = _chip_defaults()
    if target_rows is not None:
        tgt = target_rows

    G = _choose_group_tile(B, s, tgt, min_steps)   # groups per grid step
    B_pad = pl.cdiv(B, G) * G
    Cp = ((C + 127) // 128) * 128                  # lane-dense output channels

    # Fold BN (inference) into the weights IN F32, then cast to compute dtype.
    f32 = jnp.float32
    scale1 = (bn1["gamma"] / jnp.sqrt(bn1["var"] + eps)).astype(f32)
    shift1 = (bn1["beta"] - bn1["mean"] * scale1).astype(f32)
    scale2 = (bn2["gamma"] / jnp.sqrt(bn2["var"] + eps)).astype(f32)
    shift2 = (bn2["beta"] - bn2["mean"] * scale2).astype(f32)

    w1_eff = jnp.transpose(w1).astype(f32) * scale1[None, :]              # (d, C)
    w2_eff = jnp.transpose(w2).astype(f32) * scale2[None, :]              # (C, C)

    # Zero-pad channels to Cp (padded h1/h2 channels stay exactly 0 -> harmless).
    w1p = jnp.zeros((d, Cp), f32).at[:, :C].set(w1_eff).astype(compute_dtype)
    w2p = jnp.zeros((Cp, Cp), f32).at[:C, :C].set(w2_eff).astype(compute_dtype)
    shifts = jnp.zeros((2, Cp), f32).at[:, :C].set(jnp.stack([shift1, shift2], 0))

    # Channels-last data matrix, all groups stacked along rows; pad B -> B_pad.
    xg = x.reshape(B * s, d).astype(f32)
    if B_pad != B:
        xg = jnp.concatenate(
            [xg, jnp.zeros(((B_pad - B) * s, d), f32)], axis=0)
    xg = xg.astype(compute_dtype)

    grid = (B_pad // G,)
    kernel = functools.partial(_local_op_kernel, groups=G, s=s,
                               compute_dtype=compute_dtype)

    def _weight_spec(shape, single_buffer):
        # Grid-invariant inputs: double-buffering them is pure VMEM waste.
        if single_buffer:
            return pl.BlockSpec(shape, lambda i: (0,) * len(shape),
                                pipeline_mode=pl.Buffered(1))
        return pl.BlockSpec(shape, lambda i: (0,) * len(shape))

    def _run(single_buffer_weights):
        in_specs = [
            pl.BlockSpec((G * s, d), lambda i: (i, 0)),          # x rows (pipelined)
            _weight_spec((d, Cp), single_buffer_weights),        # W1^T * scale1
            _weight_spec((Cp, Cp), single_buffer_weights),       # W2^T * scale2
            _weight_spec((2, Cp), single_buffer_weights),        # [shift1; shift2]
        ]
        return pl.pallas_call(
            kernel,
            out_shape=jax.ShapeDtypeStruct((B_pad, Cp), jnp.float32),
            grid_spec=pl.GridSpec(
                grid=grid,
                in_specs=in_specs,
                out_specs=pl.BlockSpec((G, Cp), lambda i: (i, 0)),
            ),
            compiler_params=pltpu.CompilerParams(
                dimension_semantics=("parallel",)),
        )(xg, w1p, w2p, shifts)

    try:
        pooled = _run(True)
    except Exception:
        # Fallback for jax builds without BlockSpec pipeline_mode / pl.Buffered(1).
        pooled = _run(False)

    # Drop padding, then (B, C) -> (b, n, C) -> (b, C, n).
    pooled = pooled[:B, :C]
    return jnp.transpose(pooled.reshape(b, n, C), (0, 2, 1))


def _reference(x, w1, w2, bn1, bn2, eps=1e-5):
    # Pure-JAX reference with identical (eval-mode BN) semantics, f32.
    b, n, s, d = x.shape
    C = w1.shape[0]
    xg = x.reshape(b * n, s, d).astype(jnp.float32)
    sc1 = bn1["gamma"] / jnp.sqrt(bn1["var"] + eps)
    sh1 = bn1["beta"] - bn1["mean"] * sc1
    sc2 = bn2["gamma"] / jnp.sqrt(bn2["var"] + eps)
    sh2 = bn2["beta"] - bn2["mean"] * sc2
    h1 = jnp.maximum(jnp.einsum("bsd,cd->bsc", xg, w1) * sc1 + sh1, 0.0)
    h2 = jnp.maximum(jnp.einsum("bsc,ec->bse", h1, w2) * sc2 + sh2, 0.0)
    o = jnp.max(h2, axis=1)                      # (B, C)
    return jnp.transpose(o.reshape(b, n, C), (0, 2, 1))


if __name__ == "__main__":
    key = jax.random.PRNGKey(0)
    (k_x, k_w1, k_w2, k_g1, k_b1, k_g2, k_b2,
     k_m1, k_v1, k_m2, k_v2) = jax.random.split(key, 11)

    b, n, s, d = 2, 8, 16, 4        # batch, groups, points-per-group, in_channels
    C = 32                          # out_channels

    x = jax.random.normal(k_x, (b, n, s, d), dtype=jnp.float32)
    w1 = jax.random.normal(k_w1, (C, d), dtype=jnp.float32) * 0.1   # Conv1d(d, C, 1).weight.squeeze(-1)
    w2 = jax.random.normal(k_w2, (C, C), dtype=jnp.float32) * 0.1   # Conv1d(C, C, 1).weight.squeeze(-1)
    bn1 = dict(
        gamma=1.0 + 0.1 * jax.random.normal(k_g1, (C,), dtype=jnp.float32),
        beta=0.1 * jax.random.normal(k_b1, (C,), dtype=jnp.float32),
        mean=0.05 * jax.random.normal(k_m1, (C,), dtype=jnp.float32),
        var=jnp.abs(1.0 + 0.1 * jax.random.normal(k_v1, (C,), dtype=jnp.float32)),
    )
    bn2 = dict(
        gamma=1.0 + 0.1 * jax.random.normal(k_g2, (C,), dtype=jnp.float32),
        beta=0.1 * jax.random.normal(k_b2, (C,), dtype=jnp.float32),
        mean=0.05 * jax.random.normal(k_m2, (C,), dtype=jnp.float32),
        var=jnp.abs(1.0 + 0.1 * jax.random.normal(k_v2, (C,), dtype=jnp.float32)),
    )

    ref = jax.block_until_ready(_reference(x, w1, w2, bn1, bn2))

    # Exact-path (f32) check — matches the PyTorch eval-mode forward.
    out = jax.block_until_ready(local_op_forward(x, w1, w2, bn1, bn2))
    assert out.shape == (b, C, n), out.shape
    assert jnp.allclose(out, ref, atol=1e-4, rtol=1e-4)

    # Production-path (bf16 inputs/weights, f32 accumulate) sanity check.
    out_bf16 = jax.block_until_ready(
        local_op_forward(x, w1, w2, bn1, bn2, compute_dtype=jnp.bfloat16))
    assert out_bf16.shape == (b, C, n), out_bf16.shape
    assert jnp.allclose(out_bf16, ref, atol=1e-1, rtol=1e-1)

    print("KERNEL_OK")
</pallas_src>

<mosaic_0001>
module attributes {stable_mosaic.version = 11 : i64} {
  func.func @_local_op_kernel(%arg0: i32, %arg1: memref<128x4xf32, #tpu.memory_space<vmem>>, %arg2: memref<4x128xf32, #tpu.memory_space<vmem>>, %arg3: memref<128x128xf32, #tpu.memory_space<vmem>>, %arg4: memref<2x128xf32, #tpu.memory_space<vmem>>, %arg5: memref<8x128xf32, #tpu.memory_space<vmem>>) attributes {dimension_semantics = [#tpu.dimension_semantics<parallel>], iteration_bounds = array<i64: 2>, scalar_prefetch = 0 : i64, scratch_operands = 0 : i64, tpu.core_type = #tpu.core_type<tc>, window_params = [{transform_indices = @transform_0, window_bounds = array<i64: 128, 4>}, {pipeline_mode = #tpu.pipeline_mode<synchronous>, transform_indices = @transform_1, window_bounds = array<i64: 4, 128>}, {pipeline_mode = #tpu.pipeline_mode<synchronous>, transform_indices = @transform_2, window_bounds = array<i64: 128, 128>}, {pipeline_mode = #tpu.pipeline_mode<synchronous>, transform_indices = @transform_3, window_bounds = array<i64: 2, 128>}, {transform_indices = @transform_4, window_bounds = array<i64: 8, 128>}]} {
    %c0 = arith.constant 0 : index
    %c0_0 = arith.constant 0 : index
    %0 = vector.load %arg1[%c0, %c0_0] : memref<128x4xf32, #tpu.memory_space<vmem>>, vector<128x4xf32>
    %c0_1 = arith.constant 0 : index
    %c0_2 = arith.constant 0 : index
    %1 = vector.load %arg2[%c0_1, %c0_2] : memref<4x128xf32, #tpu.memory_space<vmem>>, vector<4x128xf32>
    %cst = arith.constant dense<0.000000e+00> : vector<128x128xf32>
    %2 = tpu.matmul %0, %1, %cst {dimension_numbers = #tpu.dot_dimension_numbers<[1], [0], [0], [1], [0, 0, 1, 1], [], []>} : vector<128x4xf32>, vector<4x128xf32>, vector<128x128xf32> -> vector<128x128xf32>
    %c0_3 = arith.constant 0 : index
    %c0_4 = arith.constant 0 : index
    %3 = vector.load %arg4[%c0_3, %c0_4] : memref<2x128xf32, #tpu.memory_space<vmem>>, vector<1x128xf32>
    %4 = vector.broadcast %3 : vector<1x128xf32> to vector<128x128xf32>
    %5 = arith.addf %2, %4 : vector<128x128xf32>
    %cst_5 = arith.constant 0.000000e+00 : f32
    %6 = vector.broadcast %cst_5 : f32 to vector<128x128xf32>
    %7 = arith.maximumf %5, %6 : vector<128x128xf32>
    %c0_6 = arith.constant 0 : index
    %c0_7 = arith.constant 0 : index
    %8 = vector.load %arg3[%c0_6, %c0_7] : memref<128x128xf32, #tpu.memory_space<vmem>>, vector<128x128xf32>
    %cst_8 = arith.constant dense<0.000000e+00> : vector<128x128xf32>
    %9 = tpu.matmul %7, %8, %cst_8 {dimension_numbers = #tpu.dot_dimension_numbers<[1], [0], [0], [1], [0, 0, 1, 1], [], []>} : vector<128x128xf32>, vector<128x128xf32>, vector<128x128xf32> -> vector<128x128xf32>
    %c1 = arith.constant 1 : index
    %c0_9 = arith.constant 0 : index
    %10 = vector.load %arg4[%c1, %c0_9] : memref<2x128xf32, #tpu.memory_space<vmem>>, vector<1x128xf32>
    %11 = vector.broadcast %10 : vector<1x128xf32> to vector<128x128xf32>
    %12 = arith.addf %9, %11 : vector<128x128xf32>
    %cst_10 = arith.constant 0.000000e+00 : f32
    %13 = vector.broadcast %cst_10 : f32 to vector<128x128xf32>
    %14 = arith.maximumf %12, %13 : vector<128x128xf32>
    %15 = vector.shape_cast %14 : vector<128x128xf32> to vector<8x16x128xf32>
    %cst_11 = arith.constant dense<0xFF800000> : vector<8x128xf32>
    %16 = vector.multi_reduction <maximumf>, %15, %cst_11 [1] : vector<8x16x128xf32> to vector<8x128xf32>
    %c0_12 = arith.constant 0 : index
    %c0_13 = arith.constant 0 : index
    %17 = vector.load %arg5[%c0_12, %c0_13] : memref<8x128xf32, #tpu.memory_space<vmem>>, vector<8x128xf32>
    tpu.vector_store %arg5[%c0_12, %c0_13], %16 {strides = array<i32>} : memref<8x128xf32, #tpu.memory_space<vmem>>, vector<8x128xf32>,
    return
  }
  func.func @transform_0(%arg0: i32) -> (i32, i32) {
    %c0_i32 = arith.constant 0 : i32
    %c0_i32_0 = arith.constant 0 : i32
    return %arg0, %c0_i32 : i32, i32
  }
  func.func @transform_1(%arg0: i32) -> (i32, i32) {
    %c0_i32 = arith.constant 0 : i32
    %c0_i32_0 = arith.constant 0 : i32
    %c0_i32_1 = arith.constant 0 : i32
    return %c0_i32, %c0_i32_0 : i32, i32
  }
  func.func @transform_2(%arg0: i32) -> (i32, i32) {
    %c0_i32 = arith.constant 0 : i32
    %c0_i32_0 = arith.constant 0 : i32
    %c0_i32_1 = arith.constant 0 : i32
    return %c0_i32, %c0_i32_0 : i32, i32
  }
  func.func @transform_3(%arg0: i32) -> (i32, i32) {
    %c0_i32 = arith.constant 0 : i32
    %c0_i32_0 = arith.constant 0 : i32
    %c0_i32_1 = arith.constant 0 : i32
    return %c0_i32, %c0_i32_0 : i32, i32
  }
  func.func @transform_4(%arg0: i32) -> (i32, i32) {
    %c0_i32 = arith.constant 0 : i32
    %c0_i32_0 = arith.constant 0 : i32
    return %arg0, %c0_i32 : i32, i32
  }
}

module attributes {stable_mosaic.version = 11 : i64} {
  func.func @_local_op_kernel(%arg0: i32, %arg1: memref<128x4xf32, #tpu.memory_space<vmem>>, %arg2: memref<4x128xf32, #tpu.memory_space<vmem>>, %arg3: memref<128x128xf32, #tpu.memory_space<vmem>>, %arg4: memref<2x128xf32, #tpu.memory_space<vmem>>, %arg5: memref<8x128xf32, #tpu.memory_space<vmem>>) attributes {dimension_semantics = [#tpu.dimension_semantics<parallel>], iteration_bounds = array<i64: 2>, scalar_prefetch = 0 : i64, scratch_operands = 0 : i64, tpu.core_type = #tpu.core_type<tc>, window_params = [{transform_indices = @transform_0, window_bounds = array<i64: 128, 4>}, {pipeline_mode = #tpu.pipeline_mode<synchronous>, transform_indices = @transform_1, window_bounds = array<i64: 4, 128>}, {pipeline_mode = #tpu.pipeline_mode<synchronous>, transform_indices = @transform_2, window_bounds = array<i64: 128, 128>}, {pipeline_mode = #tpu.pipeline_mode<synchronous>, transform_indices = @transform_3, window_bounds = array<i64: 2, 128>}, {transform_indices = @transform_4, window_bounds = array<i64: 8, 128>}]} {
    %c0 = arith.constant 0 : index
    %c0_0 = arith.constant 0 : index
    %0 = vector.load %arg1[%c0, %c0_0] : memref<128x4xf32, #tpu.memory_space<vmem>>, vector<128x4xf32>
    %c0_1 = arith.constant 0 : index
    %c0_2 = arith.constant 0 : index
    %1 = vector.load %arg2[%c0_1, %c0_2] : memref<4x128xf32, #tpu.memory_space<vmem>>, vector<4x128xf32>
    %cst = arith.constant dense<0.000000e+00> : vector<128x128xf32>
    %2 = tpu.matmul %0, %1, %cst {dimension_numbers = #tpu.dot_dimension_numbers<[1], [0], [0], [1], [0, 0, 1, 1], [], []>} : vector<128x4xf32>, vector<4x128xf32>, vector<128x128xf32> -> vector<128x128xf32>
    %c0_3 = arith.constant 0 : index
    %c0_4 = arith.constant 0 : index
    %3 = vector.load %arg4[%c0_3, %c0_4] : memref<2x128xf32, #tpu.memory_space<vmem>>, vector<1x128xf32>
    %4 = vector.broadcast %3 : vector<1x128xf32> to vector<128x128xf32>
    %5 = arith.addf %2, %4 : vector<128x128xf32>
    %cst_5 = arith.constant 0.000000e+00 : f32
    %6 = vector.broadcast %cst_5 : f32 to vector<128x128xf32>
    %7 = arith.maximumf %5, %6 : vector<128x128xf32>
    %c0_6 = arith.constant 0 : index
    %c0_7 = arith.constant 0 : index
    %8 = vector.load %arg3[%c0_6, %c0_7] : memref<128x128xf32, #tpu.memory_space<vmem>>, vector<128x128xf32>
    %cst_8 = arith.constant dense<0.000000e+00> : vector<128x128xf32>
    %9 = tpu.matmul %7, %8, %cst_8 {dimension_numbers = #tpu.dot_dimension_numbers<[1], [0], [0], [1], [0, 0, 1, 1], [], []>} : vector<128x128xf32>, vector<128x128xf32>, vector<128x128xf32> -> vector<128x128xf32>
    %c1 = arith.constant 1 : index
    %c0_9 = arith.constant 0 : index
    %10 = vector.load %arg4[%c1, %c0_9] : memref<2x128xf32, #tpu.memory_space<vmem>>, vector<1x128xf32>
    %11 = vector.broadcast %10 : vector<1x128xf32> to vector<128x128xf32>
    %12 = arith.addf %9, %11 : vector<128x128xf32>
    %cst_10 = arith.constant 0.000000e+00 : f32
    %13 = vector.broadcast %cst_10 : f32 to vector<128x128xf32>
    %14 = arith.maximumf %12, %13 : vector<128x128xf32>
    %15 = vector.shape_cast %14 : vector<128x128xf32> to vector<8x16x128xf32>
    %cst_11 = arith.constant dense<0xFF800000> : vector<8x128xf32>
    %16 = vector.multi_reduction <maximumf>, %15, %cst_11 [1] : vector<8x16x128xf32> to vector<8x128xf32>
    %c0_12 = arith.constant 0 : index
    %c0_13 = arith.constant 0 : index
    %17 = vector.load %arg5[%c0_12, %c0_13] : memref<8x128xf32, #tpu.memory_space<vmem>>, vector<8x128xf32>
    tpu.vector_store %arg5[%c0_12, %c0_13], %16 {strides = array<i32>} : memref<8x128xf32, #tpu.memory_space<vmem>>, vector<8x128xf32>,
    return
  }
  func.func @transform_0(%arg0: i32) -> (i32, i32) {
    %c0_i32 = arith.constant 0 : i32
    %c0_i32_0 = arith.constant 0 : i32
    return %arg0, %c0_i32 : i32, i32
  }
  func.func @transform_1(%arg0: i32) -> (i32, i32) {
    %c0_i32 = arith.constant 0 : i32
    %c0_i32_0 = arith.constant 0 : i32
    %c0_i32_1 = arith.constant 0 : i32
    return %c0_i32, %c0_i32_0 : i32, i32
  }
  func.func @transform_2(%arg0: i32) -> (i32, i32) {
    %c0_i32 = arith.constant 0 : i32
    %c0_i32_0 = arith.constant 0 : i32
    %c0_i32_1 = arith.constant 0 : i32
    return %c0_i32, %c0_i32_0 : i32, i32
  }
  func.func @transform_3(%arg0: i32) -> (i32, i32) {
    %c0_i32 = arith.constant 0 : i32
    %c0_i32_0 = arith.constant 0 : i32
    %c0_i32_1 = arith.constant 0 : i32
    return %c0_i32, %c0_i32_0 : i32, i32
  }
  func.func @transform_4(%arg0: i32) -> (i32, i32) {
    %c0_i32 = arith.constant 0 : i32
    %c0_i32_0 = arith.constant 0 : i32
    return %arg0, %c0_i32 : i32, i32
  }
}

</mosaic_0001>

<bundles_post_ra>
// kernel: tpu_custom_call.1
= control target key start
LH: loop header
LB: loop body
LE: loop exit
PB: predicated region body
PF: predicated region fallthrough
CT: control target
= control target key end

     0   :  { %9 = vsyncpa [#allocation3], 0  ;;  %s1315_s0 = inlined_call_operand.vmem [shape: f32[256,4], index: 0, kind: input, shape index: {}]   ;;  %s1316_s1 = inlined_call_operand.vmem [shape: f32[4,128], index: 1, kind: input, shape index: {}]   ;;  %s1317_s2 = inlined_call_operand.vmem [shape: f32[128,128], index: 2, kind: input, shape index: {}]   ;;  %s1318_s3 = inlined_call_operand.vmem [shape: f32[2,128], index: 3, kind: input, shape index: {}]   ;;  %s1319_s4 = inlined_call_operand.hbm [shape: f32[16,128], index: 4, kind: output, shape index: {}]  }
   0x1   :  { %11 = vsyncpa [#allocation3 + $0x1], 0  ;;  %s1107_s15 = smov 0   ;;  %s1109_s16 = smov 0  }
   0x2   :  { %s1111_s17 = smov 0   ;;  %s1113_s18 = smov 0  }
   0x3 LB: > { %s1128_s19 = sadd.s32 4294967295, %s1079_s18   ;;  %s769_s20 = sadd.s32 4294967294, %s1079_s18   ;;  %s1079_s18 = sphi %s1113_s18, %s1325_s18   ;;  %s1075_s17 = sphi %s1111_s17, %s1324_s17   ;;  %s1071_s16 = sphi %s1109_s16, %s1323_s16   ;;  %s1067_s15 = sphi %s1107_s15, %s1322_s15  }
   0x4   : > { %s1132_s21 = sadd.s32 1, %s1079_s18   ;;  %s113_s22 = sadd.s32 1, %s1075_s17 }
   0x5   : > { %s110_s23 = ssub.s32 %s1079_s18, %s1132_s21  ;;  %p123_p0 = scmp.ne.s32.totalorder %s1075_s17, %s1071_s16 }
   0x6   : > { %p111_p1 = scmp.eq.s32.totalorder %s110_s23, 0  ;;  %p124_p2 = scmp.eq.s32.totalorder %s1128_s19, 1 }
   0x7   : > { %p129_p3 = scmp.ne.s32.totalorder %s1071_s16, %s1067_s15  ;;  %p130_p4 = scmp.eq.s32.totalorder %s769_s20, 1 }
   0x8   : > { %s1143_s24 = scalar_select %p111_p1, %s1075_s17, %s113_s22  }
   0x9   : > { %p1145_p5 = por %p124_p2, %p123_p0  ;;  %p1149_p6 = por %p130_p4, %p129_p3 }
   0xa   : > { %p772_p7 = scmp.ge.s32.totalorder %s1079_s18, 1  ;;  %p166_p8 = scmp.lt.s32.totalorder %s1079_s18, 3 }
   0xc   : > { %p167_p9 = pnand %p772_p7, %p166_p8 }
   0xd   : > { %v214_v0 = vld [vmem:[%s1316_s1] sm:$0xf] (!%p167_p9)  ;;  %vm269_vm0 = vcmask (!%p167_p9), 1043456   ;;  %s774_s29 = sshll.u32 (!%p167_p9), %s1128_s19, 4  ;;  %v435_v2 = vld [vmem:[%s1317_s2 + $0x8] sm:$0xff] (!%p167_p9)  ;;  %v436_v3 = vld [vmem:[%s1317_s2 + $0x10] sm:$0xff] (!%p167_p9) }
   0xe   : > { %170 = sbr.rel (%p167_p9) target bundleno = 518 (0x206), region = 36  ;;  %v434_v1 = vld [vmem:[%s1317_s2] sm:$0xff] (!%p167_p9)  ;;  %848 = vmatprep.subr.msk.mxu0 (!%p167_p9), %vm269_vm0, %v214_v0  ;;  %p193_p10 = scmp.lt.s32.totalorder (!%p167_p9), %s774_s29, 31  ;;  %v437_v4 = vld [vmem:[%s1317_s2 + $0x18] sm:$0xff] (!%p167_p9)  ;;  %vm220_vm1 = vcmask (!%p167_p9), 31744   ;;  %v439_v8 = vld [vmem:[%s1317_s2 + $0x28] sm:$0xff] (!%p167_p9) }
   0xf   : > { %849 = vmatpush3.msk.msra.mxu0 (!%p167_p9), %vm269_vm0, %v214_v0  ;;  %v930_v5 = vpack.c.bf16 (!%p167_p9), %v435_v2, %v434_v1  ;;  %v934_v6 = vpack.c.bf16 (!%p167_p9), %v437_v4, %v436_v3  ;;  %v438_v7 = vld [vmem:[%s1317_s2 + $0x20] sm:$0xff] (!%p167_p9)  ;;  %v440_v14 = vld [vmem:[%s1317_s2 + $0x30] sm:$0xff] (!%p167_p9)  ;;  %v441_v15 = vld [vmem:[%s1317_s2 + $0x38] sm:$0xff] (!%p167_p9)  ;;  %vm680_vm2 = vcmask (!%p167_p9), 1041409   ;;  %vm682_vm3 = vcmask (!%p167_p9), 1042434   ;;  %s189_s10 = sand.u32 (!%p167_p9), 1, %s1071_s16  }
  0x10   : > { %v938_v12 = vpack.c.bf16 (!%p167_p9), %v439_v8, %v438_v7  ;;  %v942_v17 = vpack.c.bf16 (!%p167_p9), %v441_v15, %v440_v14  ;;  %v442_v19 = vld [vmem:[%s1317_s2 + $0x40] sm:$0xff] (!%p167_p9)  ;;  %v443_v20 = vld [vmem:[%s1317_s2 + $0x48] sm:$0xff] (!%p167_p9)  ;;  %v444_v24 = vld [vmem:[%s1317_s2 + $0x50] sm:$0xff] (!%p167_p9)  ;;  %vm684_vm4 = vcmask (!%p167_p9), 1043459   ;;  %vm686_vm5 = vcmask (!%p167_p9), 1044484   ;;  %s773_s11 = sshll.u32 (!%p167_p9), %s189_s10, 3 }
  0x11   : > { %931 = vmatprep.subr.bf16.mxu0 (!%p167_p9), %v930_v5  ;;  %962 = vmatprep.subr.bf16.mxu1 (!%p167_p9), %v930_v5  ;;  %v946_v22 = vpack.c.bf16 (!%p167_p9), %v443_v20, %v442_v19  ;;  %v445_v25 = vld [vmem:[%s1317_s2 + $0x58] sm:$0xff] (!%p167_p9)  ;;  %v446_v29 = vld [vmem:[%s1317_s2 + $0x60] sm:$0xff] (!%p167_p9)  ;;  %v447_v30 = vld [vmem:[%s1317_s2 + $0x68] sm:$0xff] (!%p167_p9)  ;;  %vm688_vm6 = vcmask (!%p167_p9), 1045509   ;;  %vm690_vm7 = vcmask (!%p167_p9), 1046534   ;;  %s191_s13 = scalar_lea.vmem (!%p167_p9), [#allocation2], %s773_s11 }
  0x12   : > { %970 = vmatpush3.bf16.msra.mxu1 (!%p167_p9), %v930_v5  ;;  %v950_v27 = vpack.c.bf16 (!%p167_p9), %v445_v25, %v444_v24  ;;  %v954_v32 = vpack.c.bf16 (!%p167_p9), %v447_v30, %v446_v29  ;;  %v448_v38 = vld [vmem:[%s1317_s2 + $0x70] sm:$0xff] (!%p167_p9)  ;;  %v449_v39 = vld [vmem:[%s1317_s2 + $0x78] sm:$0xff] (!%p167_p9)  ;;  %v776_v41 = vld [vmem:[%s1318_s3] ss:$0 sm:$0xff] (!%p167_p9)  ;;  %s710_s14 = sshll.u32 (!%p167_p9), %s191_s13, 4  ;;  %vm692_vm8 = vcmask (!%p167_p9), 1047559   ;;  %s1275_s14 = int_to_ptr.vmem [resolvable:$true] %s710_s14 }
  0x13   : > { %963 = vmatprep.subr.bf16.mxu1 (!%p167_p9), %v934_v6  ;;  %v958_v40 = vpack.c.bf16 (!%p167_p9), %v449_v39, %v448_v38  ;;  %s697_s28 = scalar_lea.sflag (!%p167_p9), [#allocation3], %s189_s10 }
  0x15   : > { %s1327_s29 = smov (!%p193_p10, %s774_s29), 31 }
  0x16   : > { %s775_s12 = sshll.u32 %s1327_s29, 3  ;;  %971 = vmatpush3.bf16.msra.mxu1 %v934_v6  ;;  %s1017_s29 = scalar_lea.vmem %s1275_s14, 128 }
  0x17   : > { %s1174_s20 = scalar_lea.vmem %s1315_s0, %s775_s12  ;;  %964 = vmatprep.subr.bf16.mxu1 %v938_v12  ;;  %s796_s12 = sshll.u32 %s1128_s19, 7 }
  0x18   : > { %v198_v9 = vld [vmem:[%s1174_s20] sm:$0xff]  ;;  %v199_v10 = vld [vmem:[%s1174_s20 + $0x8] sm:$0xff]  ;;  %v200_v11 = vld [vmem:[%s1174_s20 + $0x10] sm:$0xff]  ;;  %s1273_s27 = scalar_lea.hbm %s1319_s4, %s796_s12  ;;  %p1018_p11 = scmp.ne.s32.totalorder %s1275_s14, %s1017_s29 }
  0x19   : > { %850 = vmatprep.mubr.msk.f32.mxu0 %vm220_vm1, %v198_v9  ;;  %v201_v13 = vld [vmem:[%s1174_s20 + $0x18] sm:$0xff]  ;;  %v202_v16 = vld [vmem:[%s1174_s20 + $0x20] sm:$0xff]  ;;  %v203_v18 = vld [vmem:[%s1174_s20 + $0x28] sm:$0xff]  ;;  %s1081_s19 = smov [#allocation2]  }
  0x1a   : > { %851 = vmatmul.mubr.msk.f32.vlgmr.msra.gmra.mrb[0].mxu0 %vm220_vm1, %v199_v10  ;;  %972 = vmatpush3.bf16.msra.mxu1 %v938_v12  ;;  %v204_v21 = vld [vmem:[%s1174_s20 + $0x30] sm:$0xff]  ;;  %v205_v23 = vld [vmem:[%s1174_s20 + $0x38] sm:$0xff]  ;;  %v206_v26 = vld [vmem:[%s1174_s20 + $0x40] sm:$0xff]  ;;  %p1019_p12 = pnand %p1018_p11, %p1145_p5  ;;  %s1021_s30 = sshll.u32 %s1081_s19, 4  ;;  %s1022_s30 = int_to_ptr.vmem [resolvable:$false] %s1021_s30 }
  0x1b   : > { %853 = vmatprep.mubr.msk.f32.mxu0 %vm220_vm1, %v200_v11  ;;  %933 = vmatpush3.bf16.msra.mxu0 %v930_v5  ;;  %v207_v28 = vld [vmem:[%s1174_s20 + $0x48] sm:$0xff]  ;;  %v208_v31 = vld [vmem:[%s1174_s20 + $0x50] sm:$0xff]  ;;  %v209_v33 = vld [vmem:[%s1174_s20 + $0x58] sm:$0xff]  ;;  %s1023_s5 = scalar_lea.vmem %s1022_s30, 256  ;;  %p1024_p0 = scmp.lt.s32.totalorder %s1275_s14, %s1022_s30 }
  0x1c   : > { %935 = vmatprep.subr.bf16.mxu0 %v934_v6  ;;  %965 = vmatprep.subr.bf16.mxu1 %v942_v17  ;;  %v210_v34 = vld [vmem:[%s1174_s20 + $0x60] sm:$0xff]  ;;  %v211_v35 = vld [vmem:[%s1174_s20 + $0x68] sm:$0xff]  ;;  %v212_v36 = vld [vmem:[%s1174_s20 + $0x70] sm:$0xff]  ;;  %p1020_p13 = pneg %p1019_p12  ;;  %p1025_p1 = scmp.lt.s32.totalorder %s1023_s5, %s1017_s29 }
  0x1d   : > { %v213_v37 = vld [vmem:[%s1174_s20 + $0x78] sm:$0xff] }
  0x1e   : > { %854 = vmatmul.mubr.msk.f32.gmra.mrb[2].mxu0 %vm220_vm1, %v201_v13  ;;  %973 = vmatpush3.bf16.msra.mxu1 %v942_v17  ;;  %p1026_p2 = por %p1025_p1, %p1024_p0 }
  0x1f   : > { %856 = vmatprep.mubr.msk.f32.mxu0 %vm220_vm1, %v202_v16  ;;  %937 = vmatpush3.bf16.msra.mxu0 %v934_v6 }
  0x20   : > { %939 = vmatprep.subr.bf16.mxu0 %v938_v12  ;;  %966 = vmatprep.subr.bf16.mxu1 %v946_v22  ;;  %p1027_p3 = pnand %p1026_p2, %p1020_p13 }
  0x22   : > { %857 = vmatmul.mubr.msk.f32.gmra.mrb[4].mxu0 %vm220_vm1, %v203_v18  ;;  %974 = vmatpush3.bf16.msra.mxu1 %v946_v22 }
  0x23   : > { %859 = vmatprep.mubr.msk.f32.mxu0 %vm220_vm1, %v204_v21  ;;  %941 = vmatpush3.bf16.msra.mxu0 %v938_v12 }
  0x24   : > { %943 = vmatprep.subr.bf16.mxu0 %v942_v17  ;;  %967 = vmatprep.subr.bf16.mxu1 %v950_v27 }
  0x26   : > { %860 = vmatmul.mubr.msk.f32.gmra.mrb[6].mxu0 %vm220_vm1, %v205_v23  ;;  %975 = vmatpush3.bf16.msra.mxu1 %v950_v27 }
  0x27   : > { %862 = vmatprep.mubr.msk.f32.mxu0 %vm220_vm1, %v206_v26  ;;  %945 = vmatpush3.bf16.msra.mxu0 %v942_v17  ;;  %v1250_v26 = vld [vmem:[%s1318_s3 + $0x1] ss:$0 sm:$0xff] }
  0x28   : > { %947 = vmatprep.subr.bf16.mxu0 %v946_v22  ;;  %968 = vmatprep.subr.bf16.mxu1 %v954_v32 }
  0x2a   : > { %863 = vmatmul.mubr.msk.f32.gmra.mrb[8].mxu0 %vm220_vm1, %v207_v28  ;;  %976 = vmatpush3.bf16.msra.mxu1 %v954_v32 }
  0x2b   : > { %865 = vmatprep.mubr.msk.f32.mxu0 %vm220_vm1, %v208_v31  ;;  %949 = vmatpush3.bf16.msra.mxu0 %v946_v22 }
  0x2c   : > { %951 = vmatprep.subr.bf16.mxu0 %v950_v27  ;;  %969 = vmatprep.subr.bf16.mxu1 %v958_v40 }
  0x2e   : > { %866 = vmatmul.mubr.msk.f32.gmra.mrb[10].mxu0 %vm220_vm1, %v209_v33  ;;  %977 = vmatpush3.bf16.msra.mxu1 %v958_v40 }
  0x2f   : > { %868 = vmatprep.mubr.msk.f32.mxu0 %vm220_vm1, %v210_v34  ;;  %953 = vmatpush3.bf16.msra.mxu0 %v950_v27 }
  0x30   : > { %955 = vmatprep.subr.bf16.mxu0 %v954_v32 }
  0x32   : > { %869 = vmatmul.mubr.msk.f32.gmra.mrb[12].mxu0 %vm220_vm1, %v211_v35 }
  0x33   : > { %871 = vmatprep.mubr.msk.f32.mxu0 %vm220_vm1, %v212_v36  ;;  %957 = vmatpush3.bf16.msra.mxu0 %v954_v32 }
  0x34   : > { %959 = vmatprep.subr.bf16.mxu0 %v958_v40 }
  0x36   : > { %872 = vmatmul.mubr.msk.f32.gmra.mrb[14].mxu0 %vm220_vm1, %v213_v37 }
  0x37   : > { %961 = vmatpush3.bf16.msra.mxu0 %v958_v40 }
  0xed   : > { %v852_v42 = vpop.f32.mrb[0].mxu0 }
  0xee   : > { %v345_v43 = vadd.f32 %v852_v42, %v776_v41  ;;  %v339_v44 = vpop.f32.mrb[1].mxu0 }
  0xef   : > { %v340_v45 = vadd.f32 %v776_v41, %v339_v44 }
  0xf0   : > { %v419_v48 = vmax.f32 %v345_v43, 0.0 }
  0xf1   : > { %v418_v46 = vmax.f32 %v340_v45, 0.0  ;;  %v855_v47 = vpop.f32.mrb[2].mxu0 }
  0xf2   : > { %v355_v49 = vadd.f32 %v855_v47, %v776_v41  ;;  %v349_v50 = vpop.f32.mrb[3].mxu0 }
  0xf3   : > { %v350_v51 = vadd.f32 %v776_v41, %v349_v50  ;;  %906 = vmatprep.mubr.f32.mxu0 %v418_v46 }
  0xf4   : > { %907 = vmatmul.mubr.f32.vlgmr.msra.gmra.mrb[16].mxu0 %v419_v48  ;;  %v421_v54 = vmax.f32 %v355_v49, 0.0 }
  0xf5   : > { %v420_v52 = vmax.f32 %v350_v51, 0.0  ;;  %v858_v53 = vpop.f32.mrb[4].mxu0 }
  0xf6   : > { %v365_v55 = vadd.f32 %v858_v53, %v776_v41  ;;  %v359_v56 = vpop.f32.mrb[5].mxu0 }
  0xf7   : > { %v360_v57 = vadd.f32 %v776_v41, %v359_v56  ;;  %909 = vmatprep.mubr.f32.mxu0 %v420_v52 }
  0xf8   : > { %910 = vmatmul.mubr.f32.gmra.mrb[18].mxu0 %v421_v54  ;;  %v423_v60 = vmax.f32 %v365_v55, 0.0 }
  0xf9   : > { %v422_v58 = vmax.f32 %v360_v57, 0.0  ;;  %v861_v59 = vpop.f32.mrb[6].mxu0 }
  0xfa   : > { %v375_v61 = vadd.f32 %v861_v59, %v776_v41  ;;  %v369_v62 = vpop.f32.mrb[7].mxu0 }
  0xfb   : > { %912 = vmatprep.mubr.f32.mxu0 %v422_v58  ;;  %v370_v63 = vadd.f32 %v776_v41, %v369_v62 }
  0xfc   : > { %913 = vmatmul.mubr.f32.gmra.mrb[20].mxu0 %v423_v60  ;;  %v425_v2 = vmax.f32 %v375_v61, 0.0 }
  0xfd   : > { %v864_v0 = vpop.f32.mrb[8].mxu0  ;;  %v424_v1 = vmax.f32 %v370_v63, 0.0 }
  0xfe   : > { %v385_v3 = vadd.f32 %v864_v0, %v776_v41  ;;  %v379_v4 = vpop.f32.mrb[9].mxu0 }
  0xff   : > { %v380_v5 = vadd.f32 %v776_v41, %v379_v4  ;;  %915 = vmatprep.mubr.f32.mxu1 %v424_v1 }
 0x100   : > { %916 = vmatmul.mubr.f32.vlgmr.msra.gmra.mrb[0].mxu1 %v425_v2  ;;  %v427_v8 = vmax.f32 %v385_v3, 0.0 }
 0x101   : > { %v426_v6 = vmax.f32 %v380_v5, 0.0  ;;  %v867_v7 = vpop.f32.mrb[10].mxu0 }
 0x102   : > { %v395_v9 = vadd.f32 %v867_v7, %v776_v41  ;;  %v389_v10 = vpop.f32.mrb[11].mxu0 }
 0x103   : > { %v390_v11 = vadd.f32 %v776_v41, %v389_v10  ;;  %918 = vmatprep.mubr.f32.mxu1 %v426_v6 }
 0x104   : > { %919 = vmatmul.mubr.f32.gmra.mrb[2].mxu1 %v427_v8  ;;  %v429_v14 = vmax.f32 %v395_v9, 0.0 }
 0x105   : > { %v428_v12 = vmax.f32 %v390_v11, 0.0  ;;  %v870_v13 = vpop.f32.mrb[12].mxu0 }
 0x106   : > { %v405_v15 = vadd.f32 %v870_v13, %v776_v41  ;;  %v399_v16 = vpop.f32.mrb[13].mxu0 }
 0x107   : > { %v400_v17 = vadd.f32 %v776_v41, %v399_v16  ;;  %921 = vmatprep.mubr.f32.mxu1 %v428_v12 }
 0x108   : > { %922 = vmatmul.mubr.f32.gmra.mrb[4].mxu1 %v429_v14  ;;  %v431_v20 = vmax.f32 %v405_v15, 0.0 }
 0x109   : > { %v430_v18 = vmax.f32 %v400_v17, 0.0  ;;  %v873_v19 = vpop.f32.mrb[14].mxu0 }
 0x10a   : > { %v415_v21 = vadd.f32 %v873_v19, %v776_v41  ;;  %v409_v22 = vpop.f32.mrb[15].mxu0 }
 0x10b   : > { %v410_v23 = vadd.f32 %v776_v41, %v409_v22  ;;  %924 = vmatprep.mubr.f32.mxu1 %v430_v18 }
 0x10c   : > { %925 = vmatmul.mubr.f32.gmra.mrb[6].mxu1 %v431_v20  ;;  %v433_v25 = vmax.f32 %v415_v21, 0.0 }
 0x10d   : > { %v432_v24 = vmax.f32 %v410_v23, 0.0 }
 0x10f   : > { %927 = vmatprep.mubr.f32.mxu1 %v432_v24 }
 0x110   : > { %928 = vmatmul.mubr.f32.gmra.mrb[8].mxu1 %v433_v25 }
 0x1c7   : > { %v908_v27 = vpop.f32.mrb[16].mxu0 }
 0x1c8   : > { %v527_v28 = vadd.f32 %v908_v27, %v1250_v26  ;;  %v521_v29 = vpop.f32.mrb[17].mxu0 }
 0x1c9   : > { %v522_v30 = vadd.f32 %v1250_v26, %v521_v29 }
 0x1ca   : > { %v601_v31 = vmax.f32 %v527_v28, 0.0 }
 0x1cb   : > { %v600_v32 = vmax.f32 %v522_v30, 0.0  ;;  %v911_v33 = vpop.f32.mrb[18].mxu0 }
 0x1cc   : > { %v537_v34 = vadd.f32 %v911_v33, %v1250_v26  ;;  %v531_v35 = vpop.f32.mrb[19].mxu0 }
 0x1cd   : > { %v616_v36 = vmax.f32 %v600_v32, %v601_v31  ;;  %v532_v37 = vadd.f32 %v1250_v26, %v531_v35 }
 0x1ce   : > { %v603_v38 = vmax.f32 %v537_v34, 0.0 }
 0x1cf   : > { %v617_v39 = vrot.slane %v616_v36, 4  ;;  %v602_v40 = vmax.f32 %v532_v37, 0.0  ;;  %v914_v41 = vpop.f32.mrb[20].mxu0 }
 0x1d0   : > { %v547_v42 = vadd.f32 %v914_v41, %v1250_v26  ;;  %v541_v43 = vpop.f32.mrb[21].mxu0 }
 0x1d1   : > { %v618_v44 = vmax.f32 %v616_v36, %v617_v39  ;;  %v623_v45 = vmax.f32 %v602_v40, %v603_v38  ;;  %v542_v46 = vadd.f32 %v1250_v26, %v541_v43 }
 0x1d2   : > { %v605_v47 = vmax.f32 %v547_v42, 0.0 }
 0x1d3   : > { %v619_v48 = vrot.slane %v618_v44, 2  ;;  %v624_v49 = vrot.slane %v623_v45, 4  ;;  %v604_v50 = vmax.f32 %v542_v46, 0.0  ;;  %v917_v51 = vpop.f32.mrb[0].mxu1 }
 0x1d4   : > { %v557_v52 = vadd.f32 %v917_v51, %v1250_v26  ;;  %v551_v53 = vpop.f32.mrb[1].mxu1 }
 0x1d5   : > { %v620_v54 = vmax.f32 %v618_v44, %v619_v48  ;;  %v625_v55 = vmax.f32 %v623_v45, %v624_v49  ;;  %v630_v56 = vmax.f32 %v604_v50, %v605_v47  ;;  %v552_v57 = vadd.f32 %v1250_v26, %v551_v53 }
 0x1d6   : > { %v607_v58 = vmax.f32 %v557_v52, 0.0 }
 0x1d7   : > { %v626_v59 = vrot.slane %v625_v55, 2  ;;  %v631_v60 = vrot.slane %v630_v56, 4  ;;  %v606_v61 = vmax.f32 %v552_v57, 0.0  ;;  %v920_v62 = vpop.f32.mrb[2].mxu1  ;;  %v621_v63 = vrot.slane %v620_v54, 1 }
 0x1d8   : > { %v567_v0 = vadd.f32 %v920_v62, %v1250_v26  ;;  %v561_v1 = vpop.f32.mrb[3].mxu1 }
 0x1d9   : > { %v627_v2 = vmax.f32 %v625_v55, %v626_v59  ;;  %v632_v3 = vmax.f32 %v630_v56, %v631_v60  ;;  %v637_v4 = vmax.f32 %v606_v61, %v607_v58  ;;  %v562_v6 = vadd.f32 %v1250_v26, %v561_v1 }
 0x1da   : > { %v609_v5 = vmax.f32 %v567_v0, 0.0  ;;  %v622_v11 = vmax.f32 %v620_v54, %v621_v63 }
 0x1db   : > { %v628_v7 = vrot.slane %v627_v2, 1  ;;  %v633_v8 = vrot.slane %v632_v3, 2  ;;  %v638_v9 = vrot.slane %v637_v4, 4  ;;  %v923_v10 = vpop.f32.mrb[4].mxu1  ;;  %v608_v12 = vmax.f32 %v562_v6, 0.0 }
 0x1dc   : > { %v577_v13 = vadd.f32 %v923_v10, %v1250_v26  ;;  %v571_v14 = vpop.f32.mrb[5].mxu1 }
 0x1dd   : > { %v629_v15 = vmax.f32 %v627_v2, %v628_v7  ;;  %v634_v16 = vmax.f32 %v632_v3, %v633_v8  ;;  %v639_v17 = vmax.f32 %v637_v4, %v638_v9  ;;  %v572_v18 = vadd.f32 %v1250_v26, %v571_v14 }
 0x1de   : > { %v644_v19 = vmax.f32 %v608_v12, %v609_v5  ;;  %v611_v20 = vmax.f32 %v577_v13, 0.0 }
 0x1df   : > { %v681_v21 = vsel %vm680_vm2, %v629_v15, %v622_v11  ;;  %v635_v22 = vrot.slane %v634_v16, 1  ;;  %v640_v23 = vrot.slane %v639_v17, 2  ;;  %v610_v24 = vmax.f32 %v572_v18, 0.0  ;;  %v926_v25 = vpop.f32.mrb[6].mxu1 }
 0x1e0   : > { %v645_v27 = vrot.slane %v644_v19, 4  ;;  %v587_v28 = vadd.f32 %v926_v25, %v1250_v26  ;;  %v581_v29 = vpop.f32.mrb[7].mxu1 }
 0x1e1   : > { %v636_v30 = vmax.f32 %v634_v16, %v635_v22  ;;  %v641_v31 = vmax.f32 %v639_v17, %v640_v23  ;;  %v651_v32 = vmax.f32 %v610_v24, %v611_v20  ;;  %v582_v33 = vadd.f32 %v1250_v26, %v581_v29 }
 0x1e2   : > { %v646_v34 = vmax.f32 %v644_v19, %v645_v27  ;;  %v613_v35 = vmax.f32 %v587_v28, 0.0 }
 0x1e3   : > { %v683_v36 = vsel %vm682_vm3, %v636_v30, %v681_v21  ;;  %v642_v37 = vrot.slane %v641_v31, 1  ;;  %v652_v38 = vrot.slane %v651_v32, 4  ;;  %v612_v39 = vmax.f32 %v582_v33, 0.0  ;;  %v929_v40 = vpop.f32.mrb[8].mxu1 }
 0x1e4   : > { %v647_v41 = vrot.slane %v646_v34, 2  ;;  %v597_v42 = vadd.f32 %v929_v40, %v1250_v26  ;;  %v591_v43 = vpop.f32.mrb[9].mxu1 }
 0x1e5   : > { %v643_v44 = vmax.f32 %v641_v31, %v642_v37  ;;  %v653_v45 = vmax.f32 %v651_v32, %v652_v38  ;;  %v658_v46 = vmax.f32 %v612_v39, %v613_v35  ;;  %v592_v47 = vadd.f32 %v1250_v26, %v591_v43 }
 0x1e6   : > { %v648_v48 = vmax.f32 %v646_v34, %v647_v41  ;;  %v615_v49 = vmax.f32 %v597_v42, 0.0 }
 0x1e7   : > { %v654_v50 = vrot.slane %v653_v45, 2  ;;  %v659_v51 = vrot.slane %v658_v46, 4  ;;  %v614_v52 = vmax.f32 %v592_v47, 0.0  ;;  %v685_v53 = vsel %vm684_vm4, %v643_v44, %v683_v36 }
 0x1e8   : > { %v649_v54 = vrot.slane %v648_v48, 1 }
 0x1e9   : > { %v655_v55 = vmax.f32 %v653_v45, %v654_v50  ;;  %v660_v56 = vmax.f32 %v658_v46, %v659_v51  ;;  %v665_v57 = vmax.f32 %v614_v52, %v615_v49 }
 0x1ea   : > { %v650_v58 = vmax.f32 %v648_v48, %v649_v54 }
 0x1eb   : > { %v656_v59 = vrot.slane %v655_v55, 1  ;;  %v661_v60 = vrot.slane %v660_v56, 2  ;;  %v666_v61 = vrot.slane %v665_v57, 4 }
 0x1ec   : > { %v687_v62 = vsel %vm686_vm5, %v650_v58, %v685_v53 }
 0x1ed   : > { %v657_v26 = vmax.f32 %v655_v55, %v656_v59  ;;  %v662_v63 = vmax.f32 %v660_v56, %v661_v60  ;;  %v667_v0 = vmax.f32 %v665_v57, %v666_v61 }
 0x1ef   : > { %v663_v1 = vrot.slane %v662_v63, 1  ;;  %v668_v2 = vrot.slane %v667_v0, 2  ;;  %v689_v3 = vsel %vm688_vm6, %v657_v26, %v687_v62 }
 0x1f1   : > { %v664_v4 = vmax.f32 %v662_v63, %v663_v1  ;;  %v669_v5 = vmax.f32 %v667_v0, %v668_v2 }
 0x1f3   : > { %v670_v6 = vrot.slane %v669_v5, 1  ;;  %v691_v7 = vsel %vm690_vm7, %v664_v4, %v689_v3 }
 0x1f5   : > { %v671_v8 = vmax.f32 %v669_v5, %v670_v6 }
 0x1f7   : > { %v693_v9 = vsel %vm692_vm8, %v671_v8, %v691_v7 }
 0x1f8   : > { %695 = vst [vmem:[%s191_s13] sm:$0xff] %v693_v9 }
 0x1f9   : > { %1030 = shalt.err (!%p1027_p3)
}
 0x1fa   : > { %s1031_s6 = scalar_lea.hbm %s1273_s27, 128  ;;  %s1035_s20 = scalar_lea.hbm %s1319_s4, 256 }
 0x1fb   : > { %p1032_p4 = scmp.ne.s32.totalorder %s1273_s27, %s1031_s6  ;;  %p1036_p9 = scmp.lt.u32.totalorder %s1273_s27, %s1319_s4 }
 0x1fc   : > { %p1037_p10 = scmp.lt.u32.totalorder %s1035_s20, %s1031_s6  ;;  %p1039_p12 = scmp.lt.u32.totalorder %s1031_s6, %s1273_s27 }
 0x1fd   : > { %p1033_p7 = pnand %p1032_p4, %p1145_p5 }
 0x1fe   : > { %p1038_p11 = por %p1037_p10, %p1036_p9 }
 0x1ff   : > { %p1034_p8 = pneg %p1033_p7 }
 0x200   : > { %p1040_p13 = por %p1039_p12, %p1038_p11 }
 0x202   : > { %p1041_p0 = pnand %p1040_p13, %p1034_p8 }
 0x204   : > { %1044 = shalt.err (!%p1041_p0)
}
 0x205   : > { %978 = dma.vmem_to_hbm [thread:$0]  (%p1145_p5), %s1275_s14, 128, %s1273_s27, %s697_s28  }
 0x206 PF: > { %p984_p1 = scmp.ge.s32.totalorder %s1079_s18, 2  ;;  %s722_s11 = sand.u32 1, %s1067_s15  }
 0x207   : > { %s723_s12 = scalar_lea.sflag [#allocation3], %s722_s11 }
 0x208   : > { %p981_p2 = pnand %p984_p1, %p1149_p6 }
 0x20a   : > { %1062 = dma.done.wait (!%p981_p2), %s723_s12, 128  }
 0x20b   : > { %1064 = vsyncadd (!%p981_p2), %s723_s12, 4294967168  ;;  %p14_p3 = scmp.ge.s32.totalorder %s1132_s21, 4   ;;  %s1322_s15 = smov %s1071_s16 }
 0x20c   : > { %s1323_s16 = smov %s1075_s17  ;;  %s1324_s17 = smov %s1143_s24 }
 0x20d   : > { %s1325_s18 = smov %s1132_s21  ;;  %16 = sbr.rel (!%p14_p3) target bundleno = 3 (0x3), region = 71 }
 0x214   :  { %728 = vsyncpa [#allocation3], 1 }
 0x215   :  { %730 = vsyncpa [#allocation3 + $0x1], 1 }

// kernel: tpu_custom_call.1
= control target key start
LH: loop header
LB: loop body
LE: loop exit
PB: predicated region body
PF: predicated region fallthrough
CT: control target
= control target key end

     0   :  { %9 = vsyncpa [#allocation3], 0  ;;  %s1315_s0 = inlined_call_operand.vmem [shape: f32[256,4], index: 0, kind: input, shape index: {}]   ;;  %s1316_s1 = inlined_call_operand.vmem [shape: f32[4,128], index: 1, kind: input, shape index: {}]   ;;  %s1317_s2 = inlined_call_operand.vmem [shape: f32[128,128], index: 2, kind: input, shape index: {}]   ;;  %s1318_s3 = inlined_call_operand.vmem [shape: f32[2,128], index: 3, kind: input, shape index: {}]   ;;  %s1319_s4 = inlined_call_operand.hbm [shape: f32[16,128], index: 4, kind: output, shape index: {}]  }
   0x1   :  { %11 = vsyncpa [#allocation3 + $0x1], 0  ;;  %s1107_s15 = smov 0   ;;  %s1109_s16 = smov 0  }
   0x2   :  { %s1111_s17 = smov 0   ;;  %s1113_s18 = smov 0  }
   0x3 LB: > { %s1128_s19 = sadd.s32 4294967295, %s1079_s18   ;;  %s769_s20 = sadd.s32 4294967294, %s1079_s18   ;;  %s1079_s18 = sphi %s1113_s18, %s1325_s18   ;;  %s1075_s17 = sphi %s1111_s17, %s1324_s17   ;;  %s1071_s16 = sphi %s1109_s16, %s1323_s16   ;;  %s1067_s15 = sphi %s1107_s15, %s1322_s15  }
   0x4   : > { %s1132_s21 = sadd.s32 1, %s1079_s18   ;;  %s113_s22 = sadd.s32 1, %s1075_s17 }
   0x5   : > { %s110_s23 = ssub.s32 %s1079_s18, %s1132_s21  ;;  %p123_p0 = scmp.ne.s32.totalorder %s1075_s17, %s1071_s16 }
   0x6   : > { %p111_p1 = scmp.eq.s32.totalorder %s110_s23, 0  ;;  %p124_p2 = scmp.eq.s32.totalorder %s1128_s19, 1 }
   0x7   : > { %p129_p3 = scmp.ne.s32.totalorder %s1071_s16, %s1067_s15  ;;  %p130_p4 = scmp.eq.s32.totalorder %s769_s20, 1 }
   0x8   : > { %s1143_s24 = scalar_select %p111_p1, %s1075_s17, %s113_s22  }
   0x9   : > { %p1145_p5 = por %p124_p2, %p123_p0  ;;  %p1149_p6 = por %p130_p4, %p129_p3 }
   0xa   : > { %p772_p7 = scmp.ge.s32.totalorder %s1079_s18, 1  ;;  %p166_p8 = scmp.lt.s32.totalorder %s1079_s18, 3 }
   0xc   : > { %p167_p9 = pnand %p772_p7, %p166_p8 }
   0xd   : > { %v214_v0 = vld [vmem:[%s1316_s1] sm:$0xf] (!%p167_p9)  ;;  %vm269_vm0 = vcmask (!%p167_p9), 1043456   ;;  %s774_s29 = sshll.u32 (!%p167_p9), %s1128_s19, 4  ;;  %v435_v2 = vld [vmem:[%s1317_s2 + $0x8] sm:$0xff] (!%p167_p9)  ;;  %v436_v3 = vld [vmem:[%s1317_s2 + $0x10] sm:$0xff] (!%p167_p9) }
   0xe   : > { %170 = sbr.rel (%p167_p9) target bundleno = 518 (0x206), region = 36  ;;  %v434_v1 = vld [vmem:[%s1317_s2] sm:$0xff] (!%p167_p9)  ;;  %848 = vmatprep.subr.msk.mxu0 (!%p167_p9), %vm269_vm0, %v214_v0  ;;  %p193_p10 = scmp.lt.s32.totalorder (!%p167_p9), %s774_s29, 31  ;;  %v437_v4 = vld [vmem:[%s1317_s2 + $0x18] sm:$0xff] (!%p167_p9)  ;;  %vm220_vm1 = vcmask (!%p167_p9), 31744   ;;  %v439_v8 = vld [vmem:[%s1317_s2 + $0x28] sm:$0xff] (!%p167_p9) }
   0xf   : > { %849 = vmatpush3.msk.msra.mxu0 (!%p167_p9), %vm269_vm0, %v214_v0  ;;  %v930_v5 = vpack.c.bf16 (!%p167_p9), %v435_v2, %v434_v1  ;;  %v934_v6 = vpack.c.bf16 (!%p167_p9), %v437_v4, %v436_v3  ;;  %v438_v7 = vld [vmem:[%s1317_s2 + $0x20] sm:$0xff] (!%p167_p9)  ;;  %v440_v14 = vld [vmem:[%s1317_s2 + $0x30] sm:$0xff] (!%p167_p9)  ;;  %v441_v15 = vld [vmem:[%s1317_s2 + $0x38] sm:$0xff] (!%p167_p9)  ;;  %vm680_vm2 = vcmask (!%p167_p9), 1041409   ;;  %vm682_vm3 = vcmask (!%p167_p9), 1042434   ;;  %s189_s10 = sand.u32 (!%p167_p9), 1, %s1071_s16  }
  0x10   : > { %v938_v12 = vpack.c.bf16 (!%p167_p9), %v439_v8, %v438_v7  ;;  %v942_v17 = vpack.c.bf16 (!%p167_p9), %v441_v15, %v440_v14  ;;  %v442_v19 = vld [vmem:[%s1317_s2 + $0x40] sm:$0xff] (!%p167_p9)  ;;  %v443_v20 = vld [vmem:[%s1317_s2 + $0x48] sm:$0xff] (!%p167_p9)  ;;  %v444_v24 = vld [vmem:[%s1317_s2 + $0x50] sm:$0xff] (!%p167_p9)  ;;  %vm684_vm4 = vcmask (!%p167_p9), 1043459   ;;  %vm686_vm5 = vcmask (!%p167_p9), 1044484   ;;  %s773_s11 = sshll.u32 (!%p167_p9), %s189_s10, 3 }
  0x11   : > { %931 = vmatprep.subr.bf16.mxu0 (!%p167_p9), %v930_v5  ;;  %962 = vmatprep.subr.bf16.mxu1 (!%p167_p9), %v930_v5  ;;  %v946_v22 = vpack.c.bf16 (!%p167_p9), %v443_v20, %v442_v19  ;;  %v445_v25 = vld [vmem:[%s1317_s2 + $0x58] sm:$0xff] (!%p167_p9)  ;;  %v446_v29 = vld [vmem:[%s1317_s2 + $0x60] sm:$0xff] (!%p167_p9)  ;;  %v447_v30 = vld [vmem:[%s1317_s2 + $0x68] sm:$0xff] (!%p167_p9)  ;;  %vm688_vm6 = vcmask (!%p167_p9), 1045509   ;;  %vm690_vm7 = vcmask (!%p167_p9), 1046534   ;;  %s191_s13 = scalar_lea.vmem (!%p167_p9), [#allocation2], %s773_s11 }
  0x12   : > { %970 = vmatpush3.bf16.msra.mxu1 (!%p167_p9), %v930_v5  ;;  %v950_v27 = vpack.c.bf16 (!%p167_p9), %v445_v25, %v444_v24  ;;  %v954_v32 = vpack.c.bf16 (!%p167_p9), %v447_v30, %v446_v29  ;;  %v448_v38 = vld [vmem:[%s1317_s2 + $0x70] sm:$0xff] (!%p167_p9)  ;;  %v449_v39 = vld [vmem:[%s1317_s2 + $0x78] sm:$0xff] (!%p167_p9)  ;;  %v776_v41 = vld [vmem:[%s1318_s3] ss:$0 sm:$0xff] (!%p167_p9)  ;;  %s710_s14 = sshll.u32 (!%p167_p9), %s191_s13, 4  ;;  %vm692_vm8 = vcmask (!%p167_p9), 1047559   ;;  %s1275_s14 = int_to_ptr.vmem [resolvable:$true] %s710_s14 }
  0x13   : > { %963 = vmatprep.subr.bf16.mxu1 (!%p167_p9), %v934_v6  ;;  %v958_v40 = vpack.c.bf16 (!%p167_p9), %v449_v39, %v448_v38  ;;  %s697_s28 = scalar_lea.sflag (!%p167_p9), [#allocation3], %s189_s10 }
  0x15   : > { %s1327_s29 = smov (!%p193_p10, %s774_s29), 31 }
  0x16   : > { %s775_s12 = sshll.u32 %s1327_s29, 3  ;;  %971 = vmatpush3.bf16.msra.mxu1 %v934_v6  ;;  %s1017_s29 = scalar_lea.vmem %s1275_s14, 128 }
  0x17   : > { %s1174_s20 = scalar_lea.vmem %s1315_s0, %s775_s12  ;;  %964 = vmatprep.subr.bf16.mxu1 %v938_v12  ;;  %s796_s12 = sshll.u32 %s1128_s19, 7 }
  0x18   : > { %v198_v9 = vld [vmem:[%s1174_s20] sm:$0xff]  ;;  %v199_v10 = vld [vmem:[%s1174_s20 + $0x8] sm:$0xff]  ;;  %v200_v11 = vld [vmem:[%s1174_s20 + $0x10] sm:$0xff]  ;;  %s1273_s27 = scalar_lea.hbm %s1319_s4, %s796_s12  ;;  %p1018_p11 = scmp.ne.s32.totalorder %s1275_s14, %s1017_s29 }
  0x19   : > { %850 = vmatprep.mubr.msk.f32.mxu0 %vm220_vm1, %v198_v9  ;;  %v201_v13 = vld [vmem:[%s1174_s20 + $0x18] sm:$0xff]  ;;  %v202_v16 = vld [vmem:[%s1174_s20 + $0x20] sm:$0xff]  ;;  %v203_v18 = vld [vmem:[%s1174_s20 + $0x28] sm:$0xff]  ;;  %s1081_s19 = smov [#allocation2]  }
  0x1a   : > { %851 = vmatmul.mubr.msk.f32.vlgmr.msra.gmra.mrb[0].mxu0 %vm220_vm1, %v199_v10  ;;  %972 = vmatpush3.bf16.msra.mxu1 %v938_v12  ;;  %v204_v21 = vld [vmem:[%s1174_s20 + $0x30] sm:$0xff]  ;;  %v205_v23 = vld [vmem:[%s1174_s20 + $0x38] sm:$0xff]  ;;  %v206_v26 = vld [vmem:[%s1174_s20 + $0x40] sm:$0xff]  ;;  %p1019_p12 = pnand %p1018_p11, %p1145_p5  ;;  %s1021_s30 = sshll.u32 %s1081_s19, 4  ;;  %s1022_s30 = int_to_ptr.vmem [resolvable:$false] %s1021_s30 }
  0x1b   : > { %853 = vmatprep.mubr.msk.f32.mxu0 %vm220_vm1, %v200_v11  ;;  %933 = vmatpush3.bf16.msra.mxu0 %v930_v5  ;;  %v207_v28 = vld [vmem:[%s1174_s20 + $0x48] sm:$0xff]  ;;  %v208_v31 = vld [vmem:[%s1174_s20 + $0x50] sm:$0xff]  ;;  %v209_v33 = vld [vmem:[%s1174_s20 + $0x58] sm:$0xff]  ;;  %s1023_s5 = scalar_lea.vmem %s1022_s30, 256  ;;  %p1024_p0 = scmp.lt.s32.totalorder %s1275_s14, %s1022_s30 }
  0x1c   : > { %935 = vmatprep.subr.bf16.mxu0 %v934_v6  ;;  %965 = vmatprep.subr.bf16.mxu1 %v942_v17  ;;  %v210_v34 = vld [vmem:[%s1174_s20 + $0x60] sm:$0xff]  ;;  %v211_v35 = vld [vmem:[%s1174_s20 + $0x68] sm:$0xff]  ;;  %v212_v36 = vld [vmem:[%s1174_s20 + $0x70] sm:$0xff]  ;;  %p1020_p13 = pneg %p1019_p12  ;;  %p1025_p1 = scmp.lt.s32.totalorder %s1023_s5, %s1017_s29 }
  0x1d   : > { %v213_v37 = vld [vmem:[%s1174_s20 + $0x78] sm:$0xff] }
  0x1e   : > { %854 = vmatmul.mubr.msk.f32.gmra.mrb[2].mxu0 %vm220_vm1, %v201_v13  ;;  %973 = vmatpush3.bf16.msra.mxu1 %v942_v17  ;;  %p1026_p2 = por %p1025_p1, %p1024_p0 }
  0x1f   : > { %856 = vmatprep.mubr.msk.f32.mxu0 %vm220_vm1, %v202_v16  ;;  %937 = vmatpush3.bf16.msra.mxu0 %v934_v6 }
  0x20   : > { %939 = vmatprep.subr.bf16.mxu0 %v938_v12  ;;  %966 = vmatprep.subr.bf16.mxu1 %v946_v22  ;;  %p1027_p3 = pnand %p1026_p2, %p1020_p13 }
  0x22   : > { %857 = vmatmul.mubr.msk.f32.gmra.mrb[4].mxu0 %vm220_vm1, %v203_v18  ;;  %974 = vmatpush3.bf16.msra.mxu1 %v946_v22 }
  0x23   : > { %859 = vmatprep.mubr.msk.f32.mxu0 %vm220_vm1, %v204_v21  ;;  %941 = vmatpush3.bf16.msra.mxu0 %v938_v12 }
  0x24   : > { %943 = vmatprep.subr.bf16.mxu0 %v942_v17  ;;  %967 = vmatprep.subr.bf16.mxu1 %v950_v27 }
  0x26   : > { %860 = vmatmul.mubr.msk.f32.gmra.mrb[6].mxu0 %vm220_vm1, %v205_v23  ;;  %975 = vmatpush3.bf16.msra.mxu1 %v950_v27 }
  0x27   : > { %862 = vmatprep.mubr.msk.f32.mxu0 %vm220_vm1, %v206_v26  ;;  %945 = vmatpush3.bf16.msra.mxu0 %v942_v17  ;;  %v1250_v26 = vld [vmem:[%s1318_s3 + $0x1] ss:$0 sm:$0xff] }
  0x28   : > { %947 = vmatprep.subr.bf16.mxu0 %v946_v22  ;;  %968 = vmatprep.subr.bf16.mxu1 %v954_v32 }
  0x2a   : > { %863 = vmatmul.mubr.msk.f32.gmra.mrb[8].mxu0 %vm220_vm1, %v207_v28  ;;  %976 = vmatpush3.bf16.msra.mxu1 %v954_v32 }
  0x2b   : > { %865 = vmatprep.mubr.msk.f32.mxu0 %vm220_vm1, %v208_v31  ;;  %949 = vmatpush3.bf16.msra.mxu0 %v946_v22 }
  0x2c   : > { %951 = vmatprep.subr.bf16.mxu0 %v950_v27  ;;  %969 = vmatprep.subr.bf16.mxu1 %v958_v40 }
  0x2e   : > { %866 = vmatmul.mubr.msk.f32.gmra.mrb[10].mxu0 %vm220_vm1, %v209_v33  ;;  %977 = vmatpush3.bf16.msra.mxu1 %v958_v40 }
  0x2f   : > { %868 = vmatprep.mubr.msk.f32.mxu0 %vm220_vm1, %v210_v34  ;;  %953 = vmatpush3.bf16.msra.mxu0 %v950_v27 }
  0x30   : > { %955 = vmatprep.subr.bf16.mxu0 %v954_v32 }
  0x32   : > { %869 = vmatmul.mubr.msk.f32.gmra.mrb[12].mxu0 %vm220_vm1, %v211_v35 }
  0x33   : > { %871 = vmatprep.mubr.msk.f32.mxu0 %vm220_vm1, %v212_v36  ;;  %957 = vmatpush3.bf16.msra.mxu0 %v954_v32 }
  0x34   : > { %959 = vmatprep.subr.bf16.mxu0 %v958_v40 }
  0x36   : > { %872 = vmatmul.mubr.msk.f32.gmra.mrb[14].mxu0 %vm220_vm1, %v213_v37 }
  0x37   : > { %961 = vmatpush3.bf16.msra.mxu0 %v958_v40 }
  0xed   : > { %v852_v42 = vpop.f32.mrb[0].mxu0 }
  0xee   : > { %v345_v43 = vadd.f32 %v852_v42, %v776_v41  ;;  %v339_v44 = vpop.f32.mrb[1].mxu0 }
  0xef   : > { %v340_v45 = vadd.f32 %v776_v41, %v339_v44 }
  0xf0   : > { %v419_v48 = vmax.f32 %v345_v43, 0.0 }
  0xf1   : > { %v418_v46 = vmax.f32 %v340_v45, 0.0  ;;  %v855_v47 = vpop.f32.mrb[2].mxu0 }
  0xf2   : > { %v355_v49 = vadd.f32 %v855_v47, %v776_v41  ;;  %v349_v50 = vpop.f32.mrb[3].mxu0 }
  0xf3   : > { %v350_v51 = vadd.f32 %v776_v41, %v349_v50  ;;  %906 = vmatprep.mubr.f32.mxu0 %v418_v46 }
  0xf4   : > { %907 = vmatmul.mubr.f32.vlgmr.msra.gmra.mrb[16].mxu0 %v419_v48  ;;  %v421_v54 = vmax.f32 %v355_v49, 0.0 }
  0xf5   : > { %v420_v52 = vmax.f32 %v350_v51, 0.0  ;;  %v858_v53 = vpop.f32.mrb[4].mxu0 }
  0xf6   : > { %v365_v55 = vadd.f32 %v858_v53, %v776_v41  ;;  %v359_v56 = vpop.f32.mrb[5].mxu0 }
  0xf7   : > { %v360_v57 = vadd.f32 %v776_v41, %v359_v56  ;;  %909 = vmatprep.mubr.f32.mxu0 %v420_v52 }
  0xf8   : > { %910 = vmatmul.mubr.f32.gmra.mrb[18].mxu0 %v421_v54  ;;  %v423_v60 = vmax.f32 %v365_v55, 0.0 }
  0xf9   : > { %v422_v58 = vmax.f32 %v360_v57, 0.0  ;;  %v861_v59 = vpop.f32.mrb[6].mxu0 }
  0xfa   : > { %v375_v61 = vadd.f32 %v861_v59, %v776_v41  ;;  %v369_v62 = vpop.f32.mrb[7].mxu0 }
  0xfb   : > { %912 = vmatprep.mubr.f32.mxu0 %v422_v58  ;;  %v370_v63 = vadd.f32 %v776_v41, %v369_v62 }
  0xfc   : > { %913 = vmatmul.mubr.f32.gmra.mrb[20].mxu0 %v423_v60  ;;  %v425_v2 = vmax.f32 %v375_v61, 0.0 }
  0xfd   : > { %v864_v0 = vpop.f32.mrb[8].mxu0  ;;  %v424_v1 = vmax.f32 %v370_v63, 0.0 }
  0xfe   : > { %v385_v3 = vadd.f32 %v864_v0, %v776_v41  ;;  %v379_v4 = vpop.f32.mrb[9].mxu0 }
  0xff   : > { %v380_v5 = vadd.f32 %v776_v41, %v379_v4  ;;  %915 = vmatprep.mubr.f32.mxu1 %v424_v1 }
 0x100   : > { %916 = vmatmul.mubr.f32.vlgmr.msra.gmra.mrb[0].mxu1 %v425_v2  ;;  %v427_v8 = vmax.f32 %v385_v3, 0.0 }
 0x101   : > { %v426_v6 = vmax.f32 %v380_v5, 0.0  ;;  %v867_v7 = vpop.f32.mrb[10].mxu0 }
 0x102   : > { %v395_v9 = vadd.f32 %v867_v7, %v776_v41  ;;  %v389_v10 = vpop.f32.mrb[11].mxu0 }
 0x103   : > { %v390_v11 = vadd.f32 %v776_v41, %v389_v10  ;;  %918 = vmatprep.mubr.f32.mxu1 %v426_v6 }
 0x104   : > { %919 = vmatmul.mubr.f32.gmra.mrb[2].mxu1 %v427_v8  ;;  %v429_v14 = vmax.f32 %v395_v9, 0.0 }
 0x105   : > { %v428_v12 = vmax.f32 %v390_v11, 0.0  ;;  %v870_v13 = vpop.f32.mrb[12].mxu0 }
 0x106   : > { %v405_v15 = vadd.f32 %v870_v13, %v776_v41  ;;  %v399_v16 = vpop.f32.mrb[13].mxu0 }
 0x107   : > { %v400_v17 = vadd.f32 %v776_v41, %v399_v16  ;;  %921 = vmatprep.mubr.f32.mxu1 %v428_v12 }
 0x108   : > { %922 = vmatmul.mubr.f32.gmra.mrb[4].mxu1 %v429_v14  ;;  %v431_v20 = vmax.f32 %v405_v15, 0.0 }
 0x109   : > { %v430_v18 = vmax.f32 %v400_v17, 0.0  ;;  %v873_v19 = vpop.f32.mrb[14].mxu0 }
 0x10a   : > { %v415_v21 = vadd.f32 %v873_v19, %v776_v41  ;;  %v409_v22 = vpop.f32.mrb[15].mxu0 }
 0x10b   : > { %v410_v23 = vadd.f32 %v776_v41, %v409_v22  ;;  %924 = vmatprep.mubr.f32.mxu1 %v430_v18 }
 0x10c   : > { %925 = vmatmul.mubr.f32.gmra.mrb[6].mxu1 %v431_v20  ;;  %v433_v25 = vmax.f32 %v415_v21, 0.0 }
 0x10d   : > { %v432_v24 = vmax.f32 %v410_v23, 0.0 }
 0x10f   : > { %927 = vmatprep.mubr.f32.mxu1 %v432_v24 }
 0x110   : > { %928 = vmatmul.mubr.f32.gmra.mrb[8].mxu1 %v433_v25 }
 0x1c7   : > { %v908_v27 = vpop.f32.mrb[16].mxu0 }
 0x1c8   : > { %v527_v28 = vadd.f32 %v908_v27, %v1250_v26  ;;  %v521_v29 = vpop.f32.mrb[17].mxu0 }
 0x1c9   : > { %v522_v30 = vadd.f32 %v1250_v26, %v521_v29 }
 0x1ca   : > { %v601_v31 = vmax.f32 %v527_v28, 0.0 }
 0x1cb   : > { %v600_v32 = vmax.f32 %v522_v30, 0.0  ;;  %v911_v33 = vpop.f32.mrb[18].mxu0 }
 0x1cc   : > { %v537_v34 = vadd.f32 %v911_v33, %v1250_v26  ;;  %v531_v35 = vpop.f32.mrb[19].mxu0 }
 0x1cd   : > { %v616_v36 = vmax.f32 %v600_v32, %v601_v31  ;;  %v532_v37 = vadd.f32 %v1250_v26, %v531_v35 }
 0x1ce   : > { %v603_v38 = vmax.f32 %v537_v34, 0.0 }
 0x1cf   : > { %v617_v39 = vrot.slane %v616_v36, 4  ;;  %v602_v40 = vmax.f32 %v532_v37, 0.0  ;;  %v914_v41 = vpop.f32.mrb[20].mxu0 }
 0x1d0   : > { %v547_v42 = vadd.f32 %v914_v41, %v1250_v26  ;;  %v541_v43 = vpop.f32.mrb[21].mxu0 }
 0x1d1   : > { %v618_v44 = vmax.f32 %v616_v36, %v617_v39  ;;  %v623_v45 = vmax.f32 %v602_v40, %v603_v38  ;;  %v542_v46 = vadd.f32 %v1250_v26, %v541_v43 }
 0x1d2   : > { %v605_v47 = vmax.f32 %v547_v42, 0.0 }
 0x1d3   : > { %v619_v48 = vrot.slane %v618_v44, 2  ;;  %v624_v49 = vrot.slane %v623_v45, 4  ;;  %v604_v50 = vmax.f32 %v542_v46, 0.0  ;;  %v917_v51 = vpop.f32.mrb[0].mxu1 }
 0x1d4   : > { %v557_v52 = vadd.f32 %v917_v51, %v1250_v26  ;;  %v551_v53 = vpop.f32.mrb[1].mxu1 }
 0x1d5   : > { %v620_v54 = vmax.f32 %v618_v44, %v619_v48  ;;  %v625_v55 = vmax.f32 %v623_v45, %v624_v49  ;;  %v630_v56 = vmax.f32 %v604_v50, %v605_v47  ;;  %v552_v57 = vadd.f32 %v1250_v26, %v551_v53 }
 0x1d6   : > { %v607_v58 = vmax.f32 %v557_v52, 0.0 }
 0x1d7   : > { %v626_v59 = vrot.slane %v625_v55, 2  ;;  %v631_v60 = vrot.slane %v630_v56, 4  ;;  %v606_v61 = vmax.f32 %v552_v57, 0.0  ;;  %v920_v62 = vpop.f32.mrb[2].mxu1  ;;  %v621_v63 = vrot.slane %v620_v54, 1 }
 0x1d8   : > { %v567_v0 = vadd.f32 %v920_v62, %v1250_v26  ;;  %v561_v1 = vpop.f32.mrb[3].mxu1 }
 0x1d9   : > { %v627_v2 = vmax.f32 %v625_v55, %v626_v59  ;;  %v632_v3 = vmax.f32 %v630_v56, %v631_v60  ;;  %v637_v4 = vmax.f32 %v606_v61, %v607_v58  ;;  %v562_v6 = vadd.f32 %v1250_v26, %v561_v1 }
 0x1da   : > { %v609_v5 = vmax.f32 %v567_v0, 0.0  ;;  %v622_v11 = vmax.f32 %v620_v54, %v621_v63 }
 0x1db   : > { %v628_v7 = vrot.slane %v627_v2, 1  ;;  %v633_v8 = vrot.slane %v632_v3, 2  ;;  %v638_v9 = vrot.slane %v637_v4, 4  ;;  %v923_v10 = vpop.f32.mrb[4].mxu1  ;;  %v608_v12 = vmax.f32 %v562_v6, 0.0 }
 0x1dc   : > { %v577_v13 = vadd.f32 %v923_v10, %v1250_v26  ;;  %v571_v14 = vpop.f32.mrb[5].mxu1 }
 0x1dd   : > { %v629_v15 = vmax.f32 %v627_v2, %v628_v7  ;;  %v634_v16 = vmax.f32 %v632_v3, %v633_v8  ;;  %v639_v17 = vmax.f32 %v637_v4, %v638_v9  ;;  %v572_v18 = vadd.f32 %v1250_v26, %v571_v14 }
 0x1de   : > { %v644_v19 = vmax.f32 %v608_v12, %v609_v5  ;;  %v611_v20 = vmax.f32 %v577_v13, 0.0 }
 0x1df   : > { %v681_v21 = vsel %vm680_vm2, %v629_v15, %v622_v11  ;;  %v635_v22 = vrot.slane %v634_v16, 1  ;;  %v640_v23 = vrot.slane %v639_v17, 2  ;;  %v610_v24 = vmax.f32 %v572_v18, 0.0  ;;  %v926_v25 = vpop.f32.mrb[6].mxu1 }
 0x1e0   : > { %v645_v27 = vrot.slane %v644_v19, 4  ;;  %v587_v28 = vadd.f32 %v926_v25, %v1250_v26  ;;  %v581_v29 = vpop.f32.mrb[7].mxu1 }
 0x1e1   : > { %v636_v30 = vmax.f32 %v634_v16, %v635_v22  ;;  %v641_v31 = vmax.f32 %v639_v17, %v640_v23  ;;  %v651_v32 = vmax.f32 %v610_v24, %v611_v20  ;;  %v582_v33 = vadd.f32 %v1250_v26, %v581_v29 }
 0x1e2   : > { %v646_v34 = vmax.f32 %v644_v19, %v645_v27  ;;  %v613_v35 = vmax.f32 %v587_v28, 0.0 }
 0x1e3   : > { %v683_v36 = vsel %vm682_vm3, %v636_v30, %v681_v21  ;;  %v642_v37 = vrot.slane %v641_v31, 1  ;;  %v652_v38 = vrot.slane %v651_v32, 4  ;;  %v612_v39 = vmax.f32 %v582_v33, 0.0  ;;  %v929_v40 = vpop.f32.mrb[8].mxu1 }
 0x1e4   : > { %v647_v41 = vrot.slane %v646_v34, 2  ;;  %v597_v42 = vadd.f32 %v929_v40, %v1250_v26  ;;  %v591_v43 = vpop.f32.mrb[9].mxu1 }
 0x1e5   : > { %v643_v44 = vmax.f32 %v641_v31, %v642_v37  ;;  %v653_v45 = vmax.f32 %v651_v32, %v652_v38  ;;  %v658_v46 = vmax.f32 %v612_v39, %v613_v35  ;;  %v592_v47 = vadd.f32 %v1250_v26, %v591_v43 }
 0x1e6   : > { %v648_v48 = vmax.f32 %v646_v34, %v647_v41  ;;  %v615_v49 = vmax.f32 %v597_v42, 0.0 }
 0x1e7   : > { %v654_v50 = vrot.slane %v653_v45, 2  ;;  %v659_v51 = vrot.slane %v658_v46, 4  ;;  %v614_v52 = vmax.f32 %v592_v47, 0.0  ;;  %v685_v53 = vsel %vm684_vm4, %v643_v44, %v683_v36 }
 0x1e8   : > { %v649_v54 = vrot.slane %v648_v48, 1 }
 0x1e9   : > { %v655_v55 = vmax.f32 %v653_v45, %v654_v50  ;;  %v660_v56 = vmax.f32 %v658_v46, %v659_v51  ;;  %v665_v57 = vmax.f32 %v614_v52, %v615_v49 }
 0x1ea   : > { %v650_v58 = vmax.f32 %v648_v48, %v649_v54 }
 0x1eb   : > { %v656_v59 = vrot.slane %v655_v55, 1  ;;  %v661_v60 = vrot.slane %v660_v56, 2  ;;  %v666_v61 = vrot.slane %v665_v57, 4 }
 0x1ec   : > { %v687_v62 = vsel %vm686_vm5, %v650_v58, %v685_v53 }
 0x1ed   : > { %v657_v26 = vmax.f32 %v655_v55, %v656_v59  ;;  %v662_v63 = vmax.f32 %v660_v56, %v661_v60  ;;  %v667_v0 = vmax.f32 %v665_v57, %v666_v61 }
 0x1ef   : > { %v663_v1 = vrot.slane %v662_v63, 1  ;;  %v668_v2 = vrot.slane %v667_v0, 2  ;;  %v689_v3 = vsel %vm688_vm6, %v657_v26, %v687_v62 }
 0x1f1   : > { %v664_v4 = vmax.f32 %v662_v63, %v663_v1  ;;  %v669_v5 = vmax.f32 %v667_v0, %v668_v2 }
 0x1f3   : > { %v670_v6 = vrot.slane %v669_v5, 1  ;;  %v691_v7 = vsel %vm690_vm7, %v664_v4, %v689_v3 }
 0x1f5   : > { %v671_v8 = vmax.f32 %v669_v5, %v670_v6 }
 0x1f7   : > { %v693_v9 = vsel %vm692_vm8, %v671_v8, %v691_v7 }
 0x1f8   : > { %695 = vst [vmem:[%s191_s13] sm:$0xff] %v693_v9 }
 0x1f9   : > { %1030 = shalt.err (!%p1027_p3)
}
 0x1fa   : > { %s1031_s6 = scalar_lea.hbm %s1273_s27, 128  ;;  %s1035_s20 = scalar_lea.hbm %s1319_s4, 256 }
 0x1fb   : > { %p1032_p4 = scmp.ne.s32.totalorder %s1273_s27, %s1031_s6  ;;  %p1036_p9 = scmp.lt.u32.totalorder %s1273_s27, %s1319_s4 }
 0x1fc   : > { %p1037_p10 = scmp.lt.u32.totalorder %s1035_s20, %s1031_s6  ;;  %p1039_p12 = scmp.lt.u32.totalorder %s1031_s6, %s1273_s27 }
 0x1fd   : > { %p1033_p7 = pnand %p1032_p4, %p1145_p5 }
 0x1fe   : > { %p1038_p11 = por %p1037_p10, %p1036_p9 }
 0x1ff   : > { %p1034_p8 = pneg %p1033_p7 }
 0x200   : > { %p1040_p13 = por %p1039_p12, %p1038_p11 }
 0x202   : > { %p1041_p0 = pnand %p1040_p13, %p1034_p8 }
 0x204   : > { %1044 = shalt.err (!%p1041_p0)
}
 0x205   : > { %978 = dma.vmem_to_hbm [thread:$0]  (%p1145_p5), %s1275_s14, 128, %s1273_s27, %s697_s28  }
 0x206 PF: > { %p984_p1 = scmp.ge.s32.totalorder %s1079_s18, 2  ;;  %s722_s11 = sand.u32 1, %s1067_s15  }
 0x207   : > { %s723_s12 = scalar_lea.sflag [#allocation3], %s722_s11 }
 0x208   : > { %p981_p2 = pnand %p984_p1, %p1149_p6 }
 0x20a   : > { %1062 = dma.done.wait (!%p981_p2), %s723_s12, 128  }
 0x20b   : > { %1064 = vsyncadd (!%p981_p2), %s723_s12, 4294967168  ;;  %p14_p3 = scmp.ge.s32.totalorder %s1132_s21, 4   ;;  %s1322_s15 = smov %s1071_s16 }
 0x20c   : > { %s1323_s16 = smov %s1075_s17  ;;  %s1324_s17 = smov %s1143_s24 }
 0x20d   : > { %s1325_s18 = smov %s1132_s21  ;;  %16 = sbr.rel (!%p14_p3) target bundleno = 3 (0x3), region = 71 }
 0x214   :  { %728 = vsyncpa [#allocation3], 1 }
 0x215   :  { %730 = vsyncpa [#allocation3 + $0x1], 1 }

</bundles_post_ra>
